<compile_context>
chip_gen: v7x
topology: tpu7x:2x2x1
jax: 0.10.0
libtpu: 0.0.40
codegen_flags: <defaults>
</compile_context>

<pallas_src>
import jax
import jax.numpy as jnp
from jax.experimental import pallas as pl
from jax.experimental.pallas import tpu as pltpu


_LANE_UNIT = 1024          # 8 output sublane rows x 128 lanes
_N_CHUNKS = 8              # in-kernel lane chunks == dense-output sublane rows


def _round_up(x, m):
    return ((x + m - 1) // m) * m


def _make_kernel(num_chunks, dense_out):
    def kernel(x_ref, w1_ref, w2_ref, b2_ref, out_ref):
        # x_ref : (f_pad, tile) f32 slab; rows = [features..., 1.0, 0-pad].
        # w1_ref: (H, f_pad) f32, bias column aligned with the ones row.
        # w2_ref: (H, 1) f32 (dense_out) or (d_out, H) f32 (general path).
        # b2_ref: (d_out, 1) f32.
        # out_ref: (num_chunks, tile/num_chunks) (dense_out) or (d_out, tile).
        w1_bf = w1_ref[...].astype(jnp.bfloat16)          # tiny, stays in vregs
        c = x_ref.shape[1] // num_chunks
        for j in range(num_chunks):                       # static slices = views
            xj = x_ref[:, j * c:(j + 1) * c].astype(jnp.bfloat16)     # (f_pad, c)
            hj = jnp.dot(w1_bf, xj, preferred_element_type=jnp.float32)
            hj = jnp.maximum(hj, 0.0)                                  # (H, c) f32
            if dense_out:
                # fc2 on VPU (f32 mul) + XLU sublane reduce -> (1, c).
                rj = jnp.sum(hj * w2_ref[...], axis=0, keepdims=True) + b2_ref[...]
                out_ref[pl.ds(j, 1), :] = rj.astype(out_ref.dtype)
            else:
                rj = jnp.dot(w2_ref[...], hj,
                             preferred_element_type=jnp.float32) + b2_ref[...]
                out_ref[:, j * c:(j + 1) * c] = rj.astype(out_ref.dtype)

    return kernel


def irl_reward_forward(inp_pos, inp_vel, inp_yaw, w1, b1, w2, b2, *,
                       tile_n=64 * 1024,
                       vmem_limit_bytes=32 * 1024 * 1024):
    """inp_pos: (N, Dp), inp_vel: (N, Dv), inp_yaw: (N, Dy).
    Weights in PyTorch nn.Linear layout: w1 (H, Dp+Dv+Dy), b1 (H,),
    w2 (d_out, H), b2 (d_out,).  Returns reward (N, d_out)."""
    N = inp_pos.shape[0]
    dp, dv, dy = inp_pos.shape[1], inp_vel.shape[1], inp_yaw.shape[1]
    D = dp + dv + dy
    H = w1.shape[0]
    d_out = w2.shape[0]
    out_dtype = inp_pos.dtype

    f_pad = _round_up(D + 1, 8)            # features + ones row, sublane aligned

    # Agent tile: large (amortize per-step overhead), multiple of 1024, capped
    # so the grid has >= 2 steps when there is enough work (megacore sharding).
    n_ceil = _round_up(N, _LANE_UNIT)
    tile = min(_round_up(tile_n, _LANE_UNIT), n_ceil)
    if n_ceil >= 2 * _LANE_UNIT:
        tile = min(tile, _round_up(n_ceil // 2, _LANE_UNIT))
    n_pad = _round_up(N, tile)
    grid = (n_pad // tile,)

    # --- single fused preprocessing pass: concat + ones column + pad + T ---
    ones = jnp.ones((N, 1), jnp.float32)
    x_aug = jnp.concatenate(
        [inp_pos.astype(jnp.float32), inp_vel.astype(jnp.float32),
         inp_yaw.astype(jnp.float32), ones], axis=-1)                 # (N, D+1)
    slab = jnp.pad(x_aug, ((0, n_pad - N), (0, f_pad - (D + 1)))).T   # (f_pad, n_pad)

    # [W1 | b1 | 0]: bias folded into the matmul via the ones row.
    w1_aug = jnp.concatenate(
        [w1.astype(jnp.float32), b1.reshape(H, 1).astype(jnp.float32)], axis=-1)
    w1_pad = jnp.pad(w1_aug, ((0, 0), (0, f_pad - (D + 1))))          # (H, f_pad)
    b2_c = b2.reshape(d_out, 1).astype(jnp.float32)

    dense_out = (d_out == 1)
    if dense_out:
        w2_c = w2.reshape(H, 1).astype(jnp.float32)                   # VPU fc2
        w2_block = (H, 1)
        out_shape = jax.ShapeDtypeStruct((_N_CHUNKS, n_pad // _N_CHUNKS), out_dtype)
        out_spec = pl.BlockSpec((_N_CHUNKS, tile // _N_CHUNKS), lambda i: (0, i))
    else:
        w2_c = w2.astype(jnp.float32)                                 # MXU fc2
        w2_block = (d_out, H)
        out_shape = jax.ShapeDtypeStruct((d_out, n_pad), out_dtype)
        out_spec = pl.BlockSpec((d_out, tile), lambda i: (0, i))

    out = pl.pallas_call(
        _make_kernel(_N_CHUNKS, dense_out),
        out_shape=out_shape,
        grid_spec=pltpu.PrefetchScalarGridSpec(
            num_scalar_prefetch=0,
            grid=grid,
            in_specs=[
                pl.BlockSpec((f_pad, tile), lambda i: (0, i)),   # fused input slab
                pl.BlockSpec((H, f_pad), lambda i: (0, 0)),      # [W1 | b1] resident
                pl.BlockSpec(w2_block, lambda i: (0, 0)),        # W2 resident
                pl.BlockSpec((d_out, 1), lambda i: (0, 0)),      # b2 resident
            ],
            out_specs=out_spec,
        ),
        compiler_params=pltpu.CompilerParams(
            dimension_semantics=("parallel",),
            vmem_limit_bytes=vmem_limit_bytes),
    )(slab, w1_pad, w2_c, b2_c)

    if dense_out:
        # (8, n_pad/8): row j of grid block i holds agents i*tile + j*(tile/8) + c.
        c = tile // _N_CHUNKS
        r = out.reshape(_N_CHUNKS, grid[0], c).transpose(1, 0, 2).reshape(n_pad)
        return r[:N].reshape(N, 1)
    return out.T[:N]


def _references(inp_pos, inp_vel, inp_yaw, w1, b1, w2, b2):
    x = jnp.concatenate([inp_pos, inp_vel, inp_yaw], axis=-1)
    ref_f32 = jnp.maximum(x @ w1.T + b1, 0.0) @ w2.T + b2
    # Matched precision: bf16 fc1 operands (bias folded), f32 accumulate, f32 fc2.
    x_aug = jnp.concatenate([x, jnp.ones((x.shape[0], 1), jnp.float32)], axis=-1)
    w1_aug = jnp.concatenate([w1, b1[:, None]], axis=-1)
    h_m = jax.lax.dot_general(
        x_aug.astype(jnp.bfloat16), w1_aug.T.astype(jnp.bfloat16),
        dimension_numbers=(((1,), (0,)), ((), ())),
        preferred_element_type=jnp.float32)
    ref_matched = jnp.maximum(h_m, 0.0) @ w2.T + b2
    return ref_f32, ref_matched


if __name__ == "__main__":
    key = jax.random.PRNGKey(0)
    k_pos, k_vel, k_yaw, k_w1, k_b1, k_w2, k_b2 = jax.random.split(key, 7)

    # Small synthetic "HeteroData" agent features (N not a multiple of the tile).
    num_agents = 200
    pos_dim, vel_dim, yaw_dim = 2, 2, 1
    num_inputs = pos_dim + vel_dim + yaw_dim      # 5
    num_hidden = 32
    num_outputs = 1

    inp_pos = jax.random.normal(k_pos, (num_agents, pos_dim), jnp.float32)
    inp_vel = jax.random.normal(k_vel, (num_agents, vel_dim), jnp.float32)
    inp_yaw = jax.random.normal(k_yaw, (num_agents, yaw_dim), jnp.float32)

    # TODO(synk): edge_index is read in the reference forward() but never used
    # for compute, so it is omitted here (does not affect the output).

    # PyTorch nn.Linear layout: weight (out_features, in_features), bias (out,).
    lim1 = 1.0 / jnp.sqrt(jnp.float32(num_inputs))
    lim2 = 1.0 / jnp.sqrt(jnp.float32(num_hidden))
    w1 = jax.random.uniform(k_w1, (num_hidden, num_inputs), jnp.float32, -lim1, lim1)
    b1 = jax.random.uniform(k_b1, (num_hidden,), jnp.float32, -lim1, lim1)
    w2 = jax.random.uniform(k_w2, (num_outputs, num_hidden), jnp.float32, -lim2, lim2)
    b2 = jax.random.uniform(k_b2, (num_outputs,), jnp.float32, -lim2, lim2)

    reward = irl_reward_forward(inp_pos, inp_vel, inp_yaw, w1, b1, w2, b2)
    reward = jax.block_until_ready(reward)
    assert reward.shape == (num_agents, num_outputs)

    ref_f32, ref_matched = _references(inp_pos, inp_vel, inp_yaw, w1, b1, w2, b2)
    assert jnp.allclose(reward, ref_matched, atol=5e-3, rtol=5e-3), \
        "mismatch vs matched-precision reference"
    assert jnp.allclose(reward, ref_f32, atol=5e-2, rtol=5e-2), \
        "mismatch vs f32 reference"

    # Second small check that exercises grid > 1 and the dense-output
    # un-interleave (tile forced down to 1024 lanes).
    n2 = 2500
    k2p, k2v, k2y = jax.random.split(jax.random.PRNGKey(1), 3)
    p2 = jax.random.normal(k2p, (n2, pos_dim), jnp.float32)
    v2 = jax.random.normal(k2v, (n2, vel_dim), jnp.float32)
    y2 = jax.random.normal(k2y, (n2, yaw_dim), jnp.float32)
    r2 = jax.block_until_ready(
        irl_reward_forward(p2, v2, y2, w1, b1, w2, b2, tile_n=1024))
    ref2_f32, ref2_matched = _references(p2, v2, y2, w1, b1, w2, b2)
    assert r2.shape == (n2, num_outputs)
    assert jnp.allclose(r2, ref2_matched, atol=5e-3, rtol=5e-3), \
        "multi-tile mismatch vs matched-precision reference"
    assert jnp.allclose(r2, ref2_f32, atol=5e-2, rtol=5e-2), \
        "multi-tile mismatch vs f32 reference"

    print("KERNEL_OK")
</pallas_src>

<mosaic_0001>
module attributes {stable_mosaic.version = 11 : i64} {
  func.func @kernel(%arg0: i32, %arg1: memref<8x1024xf32, #tpu.memory_space<vmem>>, %arg2: memref<32x8xf32, #tpu.memory_space<vmem>>, %arg3: memref<32x1xf32, #tpu.memory_space<vmem>>, %arg4: memref<1x1xf32, #tpu.memory_space<vmem>>, %arg5: memref<8x128xf32, #tpu.memory_space<vmem>>) attributes {dimension_semantics = [#tpu.dimension_semantics<parallel>], iteration_bounds = array<i64: 1>, scalar_prefetch = 0 : i64, scratch_operands = 0 : i64, tpu.core_type = #tpu.core_type<tc>, window_params = [{transform_indices = @transform_0, window_bounds = array<i64: 8, 1024>}, {pipeline_mode = #tpu.pipeline_mode<synchronous>, transform_indices = @transform_1, window_bounds = array<i64: 32, 8>}, {pipeline_mode = #tpu.pipeline_mode<synchronous>, transform_indices = @transform_2, window_bounds = array<i64: 32, 1>}, {pipeline_mode = #tpu.pipeline_mode<synchronous>, transform_indices = @transform_3, window_bounds = array<i64: 1, 1>}, {transform_indices = @transform_4, window_bounds = array<i64: 8, 128>}]} {
    %c0 = arith.constant 0 : index
    %c0_0 = arith.constant 0 : index
    %0 = vector.load %arg2[%c0, %c0_0] : memref<32x8xf32, #tpu.memory_space<vmem>>, vector<32x8xf32>
    %1 = arith.truncf %0 : vector<32x8xf32> to vector<32x8xbf16>
    %c0_1 = arith.constant 0 : index
    %c0_2 = arith.constant 0 : index
    %2 = vector.load %arg1[%c0_1, %c0_2] : memref<8x1024xf32, #tpu.memory_space<vmem>>, vector<8x128xf32>
    %3 = arith.truncf %2 : vector<8x128xf32> to vector<8x128xbf16>
    %cst = arith.constant dense<0.000000e+00> : vector<32x128xf32>
    %4 = tpu.matmul %1, %3, %cst {dimension_numbers = #tpu.dot_dimension_numbers<[1], [0], [0], [1], [0, 0, 1, 1], [], []>} : vector<32x8xbf16>, vector<8x128xbf16>, vector<32x128xf32> -> vector<32x128xf32>
    %cst_3 = arith.constant 0.000000e+00 : f32
    %5 = vector.broadcast %cst_3 : f32 to vector<32x128xf32>
    %6 = arith.maximumf %4, %5 : vector<32x128xf32>
    %c0_4 = arith.constant 0 : index
    %c0_5 = arith.constant 0 : index
    %7 = vector.load %arg3[%c0_4, %c0_5] : memref<32x1xf32, #tpu.memory_space<vmem>>, vector<32x1xf32>
    %8 = vector.broadcast %7 : vector<32x1xf32> to vector<32x128xf32>
    %9 = arith.mulf %6, %8 : vector<32x128xf32>
    %cst_6 = arith.constant dense<0.000000e+00> : vector<128xf32>
    %10 = vector.multi_reduction <add>, %9, %cst_6 [0] : vector<32x128xf32> to vector<128xf32>
    %11 = vector.shape_cast %10 : vector<128xf32> to vector<1x128xf32>
    %c0_7 = arith.constant 0 : index
    %c0_8 = arith.constant 0 : index
    %12 = vector.load %arg4[%c0_7, %c0_8] : memref<1x1xf32, #tpu.memory_space<vmem>>, vector<1x1xf32>
    %13 = vector.broadcast %12 : vector<1x1xf32> to vector<1x128xf32>
    %14 = arith.addf %11, %13 : vector<1x128xf32>
    %c0_9 = arith.constant 0 : index
    %c0_10 = arith.constant 0 : index
    %15 = vector.load %arg5[%c0_9, %c0_10] : memref<8x128xf32, #tpu.memory_space<vmem>>, vector<1x128xf32>
    tpu.vector_store %arg5[%c0_9, %c0_10], %14 {strides = array<i32>} : memref<8x128xf32, #tpu.memory_space<vmem>>, vector<1x128xf32>,
    %c0_11 = arith.constant 0 : index
    %c128 = arith.constant 128 : index
    %16 = vector.load %arg1[%c0_11, %c128] : memref<8x1024xf32, #tpu.memory_space<vmem>>, vector<8x128xf32>
    %17 = arith.truncf %16 : vector<8x128xf32> to vector<8x128xbf16>
    %cst_12 = arith.constant dense<0.000000e+00> : vector<32x128xf32>
    %18 = tpu.matmul %1, %17, %cst_12 {dimension_numbers = #tpu.dot_dimension_numbers<[1], [0], [0], [1], [0, 0, 1, 1], [], []>} : vector<32x8xbf16>, vector<8x128xbf16>, vector<32x128xf32> -> vector<32x128xf32>
    %cst_13 = arith.constant 0.000000e+00 : f32
    %19 = vector.broadcast %cst_13 : f32 to vector<32x128xf32>
    %20 = arith.maximumf %18, %19 : vector<32x128xf32>
    %c0_14 = arith.constant 0 : index
    %c0_15 = arith.constant 0 : index
    %21 = vector.load %arg3[%c0_14, %c0_15] : memref<32x1xf32, #tpu.memory_space<vmem>>, vector<32x1xf32>
    %22 = vector.broadcast %21 : vector<32x1xf32> to vector<32x128xf32>
    %23 = arith.mulf %20, %22 : vector<32x128xf32>
    %cst_16 = arith.constant dense<0.000000e+00> : vector<128xf32>
    %24 = vector.multi_reduction <add>, %23, %cst_16 [0] : vector<32x128xf32> to vector<128xf32>
    %25 = vector.shape_cast %24 : vector<128xf32> to vector<1x128xf32>
    %c0_17 = arith.constant 0 : index
    %c0_18 = arith.constant 0 : index
    %26 = vector.load %arg4[%c0_17, %c0_18] : memref<1x1xf32, #tpu.memory_space<vmem>>, vector<1x1xf32>
    %27 = vector.broadcast %26 : vector<1x1xf32> to vector<1x128xf32>
    %28 = arith.addf %25, %27 : vector<1x128xf32>
    %c1 = arith.constant 1 : index
    %c0_19 = arith.constant 0 : index
    %29 = vector.load %arg5[%c1, %c0_19] : memref<8x128xf32, #tpu.memory_space<vmem>>, vector<1x128xf32>
    tpu.vector_store %arg5[%c1, %c0_19], %28 {strides = array<i32>} : memref<8x128xf32, #tpu.memory_space<vmem>>, vector<1x128xf32>,
    %c0_20 = arith.constant 0 : index
    %c256 = arith.constant 256 : index
    %30 = vector.load %arg1[%c0_20, %c256] : memref<8x1024xf32, #tpu.memory_space<vmem>>, vector<8x128xf32>
    %31 = arith.truncf %30 : vector<8x128xf32> to vector<8x128xbf16>
    %cst_21 = arith.constant dense<0.000000e+00> : vector<32x128xf32>
    %32 = tpu.matmul %1, %31, %cst_21 {dimension_numbers = #tpu.dot_dimension_numbers<[1], [0], [0], [1], [0, 0, 1, 1], [], []>} : vector<32x8xbf16>, vector<8x128xbf16>, vector<32x128xf32> -> vector<32x128xf32>
    %cst_22 = arith.constant 0.000000e+00 : f32
    %33 = vector.broadcast %cst_22 : f32 to vector<32x128xf32>
    %34 = arith.maximumf %32, %33 : vector<32x128xf32>
    %c0_23 = arith.constant 0 : index
    %c0_24 = arith.constant 0 : index
    %35 = vector.load %arg3[%c0_23, %c0_24] : memref<32x1xf32, #tpu.memory_space<vmem>>, vector<32x1xf32>
    %36 = vector.broadcast %35 : vector<32x1xf32> to vector<32x128xf32>
    %37 = arith.mulf %34, %36 : vector<32x128xf32>
    %cst_25 = arith.constant dense<0.000000e+00> : vector<128xf32>
    %38 = vector.multi_reduction <add>, %37, %cst_25 [0] : vector<32x128xf32> to vector<128xf32>
    %39 = vector.shape_cast %38 : vector<128xf32> to vector<1x128xf32>
    %c0_26 = arith.constant 0 : index
    %c0_27 = arith.constant 0 : index
    %40 = vector.load %arg4[%c0_26, %c0_27] : memref<1x1xf32, #tpu.memory_space<vmem>>, vector<1x1xf32>
    %41 = vector.broadcast %40 : vector<1x1xf32> to vector<1x128xf32>
    %42 = arith.addf %39, %41 : vector<1x128xf32>
    %c2 = arith.constant 2 : index
    %c0_28 = arith.constant 0 : index
    %43 = vector.load %arg5[%c2, %c0_28] : memref<8x128xf32, #tpu.memory_space<vmem>>, vector<1x128xf32>
    tpu.vector_store %arg5[%c2, %c0_28], %42 {strides = array<i32>} : memref<8x128xf32, #tpu.memory_space<vmem>>, vector<1x128xf32>,
    %c0_29 = arith.constant 0 : index
    %c384 = arith.constant 384 : index
    %44 = vector.load %arg1[%c0_29, %c384] : memref<8x1024xf32, #tpu.memory_space<vmem>>, vector<8x128xf32>
    %45 = arith.truncf %44 : vector<8x128xf32> to vector<8x128xbf16>
    %cst_30 = arith.constant dense<0.000000e+00> : vector<32x128xf32>
    %46 = tpu.matmul %1, %45, %cst_30 {dimension_numbers = #tpu.dot_dimension_numbers<[1], [0], [0], [1], [0, 0, 1, 1], [], []>} : vector<32x8xbf16>, vector<8x128xbf16>, vector<32x128xf32> -> vector<32x128xf32>
    %cst_31 = arith.constant 0.000000e+00 : f32
    %47 = vector.broadcast %cst_31 : f32 to vector<32x128xf32>
    %48 = arith.maximumf %46, %47 : vector<32x128xf32>
    %c0_32 = arith.constant 0 : index
    %c0_33 = arith.constant 0 : index
    %49 = vector.load %arg3[%c0_32, %c0_33] : memref<32x1xf32, #tpu.memory_space<vmem>>, vector<32x1xf32>
    %50 = vector.broadcast %49 : vector<32x1xf32> to vector<32x128xf32>
    %51 = arith.mulf %48, %50 : vector<32x128xf32>
    %cst_34 = arith.constant dense<0.000000e+00> : vector<128xf32>
    %52 = vector.multi_reduction <add>, %51, %cst_34 [0] : vector<32x128xf32> to vector<128xf32>
    %53 = vector.shape_cast %52 : vector<128xf32> to vector<1x128xf32>
    %c0_35 = arith.constant 0 : index
    %c0_36 = arith.constant 0 : index
    %54 = vector.load %arg4[%c0_35, %c0_36] : memref<1x1xf32, #tpu.memory_space<vmem>>, vector<1x1xf32>
    %55 = vector.broadcast %54 : vector<1x1xf32> to vector<1x128xf32>
    %56 = arith.addf %53, %55 : vector<1x128xf32>
    %c3 = arith.constant 3 : index
    %c0_37 = arith.constant 0 : index
    %57 = vector.load %arg5[%c3, %c0_37] : memref<8x128xf32, #tpu.memory_space<vmem>>, vector<1x128xf32>
    tpu.vector_store %arg5[%c3, %c0_37], %56 {strides = array<i32>} : memref<8x128xf32, #tpu.memory_space<vmem>>, vector<1x128xf32>,
    %c0_38 = arith.constant 0 : index
    %c512 = arith.constant 512 : index
    %58 = vector.load %arg1[%c0_38, %c512] : memref<8x1024xf32, #tpu.memory_space<vmem>>, vector<8x128xf32>
    %59 = arith.truncf %58 : vector<8x128xf32> to vector<8x128xbf16>
    %cst_39 = arith.constant dense<0.000000e+00> : vector<32x128xf32>
    %60 = tpu.matmul %1, %59, %cst_39 {dimension_numbers = #tpu.dot_dimension_numbers<[1], [0], [0], [1], [0, 0, 1, 1], [], []>} : vector<32x8xbf16>, vector<8x128xbf16>, vector<32x128xf32> -> vector<32x128xf32>
    %cst_40 = arith.constant 0.000000e+00 : f32
    %61 = vector.broadcast %cst_40 : f32 to vector<32x128xf32>
    %62 = arith.maximumf %60, %61 : vector<32x128xf32>
    %c0_41 = arith.constant 0 : index
    %c0_42 = arith.constant 0 : index
    %63 = vector.load %arg3[%c0_41, %c0_42] : memref<32x1xf32, #tpu.memory_space<vmem>>, vector<32x1xf32>
    %64 = vector.broadcast %63 : vector<32x1xf32> to vector<32x128xf32>
    %65 = arith.mulf %62, %64 : vector<32x128xf32>
    %cst_43 = arith.constant dense<0.000000e+00> : vector<128xf32>
    %66 = vector.multi_reduction <add>, %65, %cst_43 [0] : vector<32x128xf32> to vector<128xf32>
    %67 = vector.shape_cast %66 : vector<128xf32> to vector<1x128xf32>
    %c0_44 = arith.constant 0 : index
    %c0_45 = arith.constant 0 : index
    %68 = vector.load %arg4[%c0_44, %c0_45] : memref<1x1xf32, #tpu.memory_space<vmem>>, vector<1x1xf32>
    %69 = vector.broadcast %68 : vector<1x1xf32> to vector<1x128xf32>
    %70 = arith.addf %67, %69 : vector<1x128xf32>
    %c4 = arith.constant 4 : index
    %c0_46 = arith.constant 0 : index
    %71 = vector.load %arg5[%c4, %c0_46] : memref<8x128xf32, #tpu.memory_space<vmem>>, vector<1x128xf32>
    tpu.vector_store %arg5[%c4, %c0_46], %70 {strides = array<i32>} : memref<8x128xf32, #tpu.memory_space<vmem>>, vector<1x128xf32>,
    %c0_47 = arith.constant 0 : index
    %c640 = arith.constant 640 : index
    %72 = vector.load %arg1[%c0_47, %c640] : memref<8x1024xf32, #tpu.memory_space<vmem>>, vector<8x128xf32>
    %73 = arith.truncf %72 : vector<8x128xf32> to vector<8x128xbf16>
    %cst_48 = arith.constant dense<0.000000e+00> : vector<32x128xf32>
    %74 = tpu.matmul %1, %73, %cst_48 {dimension_numbers = #tpu.dot_dimension_numbers<[1], [0], [0], [1], [0, 0, 1, 1], [], []>} : vector<32x8xbf16>, vector<8x128xbf16>, vector<32x128xf32> -> vector<32x128xf32>
    %cst_49 = arith.constant 0.000000e+00 : f32
    %75 = vector.broadcast %cst_49 : f32 to vector<32x128xf32>
    %76 = arith.maximumf %74, %75 : vector<32x128xf32>
    %c0_50 = arith.constant 0 : index
    %c0_51 = arith.constant 0 : index
    %77 = vector.load %arg3[%c0_50, %c0_51] : memref<32x1xf32, #tpu.memory_space<vmem>>, vector<32x1xf32>
    %78 = vector.broadcast %77 : vector<32x1xf32> to vector<32x128xf32>
    %79 = arith.mulf %76, %78 : vector<32x128xf32>
    %cst_52 = arith.constant dense<0.000000e+00> : vector<128xf32>
    %80 = vector.multi_reduction <add>, %79, %cst_52 [0] : vector<32x128xf32> to vector<128xf32>
    %81 = vector.shape_cast %80 : vector<128xf32> to vector<1x128xf32>
    %c0_53 = arith.constant 0 : index
    %c0_54 = arith.constant 0 : index
    %82 = vector.load %arg4[%c0_53, %c0_54] : memref<1x1xf32, #tpu.memory_space<vmem>>, vector<1x1xf32>
    %83 = vector.broadcast %82 : vector<1x1xf32> to vector<1x128xf32>
    %84 = arith.addf %81, %83 : vector<1x128xf32>
    %c5 = arith.constant 5 : index
    %c0_55 = arith.constant 0 : index
    %85 = vector.load %arg5[%c5, %c0_55] : memref<8x128xf32, #tpu.memory_space<vmem>>, vector<1x128xf32>
    tpu.vector_store %arg5[%c5, %c0_55], %84 {strides = array<i32>} : memref<8x128xf32, #tpu.memory_space<vmem>>, vector<1x128xf32>,
    %c0_56 = arith.constant 0 : index
    %c768 = arith.constant 768 : index
    %86 = vector.load %arg1[%c0_56, %c768] : memref<8x1024xf32, #tpu.memory_space<vmem>>, vector<8x128xf32>
    %87 = arith.truncf %86 : vector<8x128xf32> to vector<8x128xbf16>
    %cst_57 = arith.constant dense<0.000000e+00> : vector<32x128xf32>
    %88 = tpu.matmul %1, %87, %cst_57 {dimension_numbers = #tpu.dot_dimension_numbers<[1], [0], [0], [1], [0, 0, 1, 1], [], []>} : vector<32x8xbf16>, vector<8x128xbf16>, vector<32x128xf32> -> vector<32x128xf32>
    %cst_58 = arith.constant 0.000000e+00 : f32
    %89 = vector.broadcast %cst_58 : f32 to vector<32x128xf32>
    %90 = arith.maximumf %88, %89 : vector<32x128xf32>
    %c0_59 = arith.constant 0 : index
    %c0_60 = arith.constant 0 : index
    %91 = vector.load %arg3[%c0_59, %c0_60] : memref<32x1xf32, #tpu.memory_space<vmem>>, vector<32x1xf32>
    %92 = vector.broadcast %91 : vector<32x1xf32> to vector<32x128xf32>
    %93 = arith.mulf %90, %92 : vector<32x128xf32>
    %cst_61 = arith.constant dense<0.000000e+00> : vector<128xf32>
    %94 = vector.multi_reduction <add>, %93, %cst_61 [0] : vector<32x128xf32> to vector<128xf32>
    %95 = vector.shape_cast %94 : vector<128xf32> to vector<1x128xf32>
    %c0_62 = arith.constant 0 : index
    %c0_63 = arith.constant 0 : index
    %96 = vector.load %arg4[%c0_62, %c0_63] : memref<1x1xf32, #tpu.memory_space<vmem>>, vector<1x1xf32>
    %97 = vector.broadcast %96 : vector<1x1xf32> to vector<1x128xf32>
    %98 = arith.addf %95, %97 : vector<1x128xf32>
    %c6 = arith.constant 6 : index
    %c0_64 = arith.constant 0 : index
    %99 = vector.load %arg5[%c6, %c0_64] : memref<8x128xf32, #tpu.memory_space<vmem>>, vector<1x128xf32>
    tpu.vector_store %arg5[%c6, %c0_64], %98 {strides = array<i32>} : memref<8x128xf32, #tpu.memory_space<vmem>>, vector<1x128xf32>,
    %c0_65 = arith.constant 0 : index
    %c896 = arith.constant 896 : index
    %100 = vector.load %arg1[%c0_65, %c896] : memref<8x1024xf32, #tpu.memory_space<vmem>>, vector<8x128xf32>
    %101 = arith.truncf %100 : vector<8x128xf32> to vector<8x128xbf16>
    %cst_66 = arith.constant dense<0.000000e+00> : vector<32x128xf32>
    %102 = tpu.matmul %1, %101, %cst_66 {dimension_numbers = #tpu.dot_dimension_numbers<[1], [0], [0], [1], [0, 0, 1, 1], [], []>} : vector<32x8xbf16>, vector<8x128xbf16>, vector<32x128xf32> -> vector<32x128xf32>
    %cst_67 = arith.constant 0.000000e+00 : f32
    %103 = vector.broadcast %cst_67 : f32 to vector<32x128xf32>
    %104 = arith.maximumf %102, %103 : vector<32x128xf32>
    %c0_68 = arith.constant 0 : index
    %c0_69 = arith.constant 0 : index
    %105 = vector.load %arg3[%c0_68, %c0_69] : memref<32x1xf32, #tpu.memory_space<vmem>>, vector<32x1xf32>
    %106 = vector.broadcast %105 : vector<32x1xf32> to vector<32x128xf32>
    %107 = arith.mulf %104, %106 : vector<32x128xf32>
    %cst_70 = arith.constant dense<0.000000e+00> : vector<128xf32>
    %108 = vector.multi_reduction <add>, %107, %cst_70 [0] : vector<32x128xf32> to vector<128xf32>
    %109 = vector.shape_cast %108 : vector<128xf32> to vector<1x128xf32>
    %c0_71 = arith.constant 0 : index
    %c0_72 = arith.constant 0 : index
    %110 = vector.load %arg4[%c0_71, %c0_72] : memref<1x1xf32, #tpu.memory_space<vmem>>, vector<1x1xf32>
    %111 = vector.broadcast %110 : vector<1x1xf32> to vector<1x128xf32>
    %112 = arith.addf %109, %111 : vector<1x128xf32>
    %c7 = arith.constant 7 : index
    %c0_73 = arith.constant 0 : index
    %113 = vector.load %arg5[%c7, %c0_73] : memref<8x128xf32, #tpu.memory_space<vmem>>, vector<1x128xf32>
    tpu.vector_store %arg5[%c7, %c0_73], %112 {strides = array<i32>} : memref<8x128xf32, #tpu.memory_space<vmem>>, vector<1x128xf32>,
    return
  }
  func.func @transform_0(%arg0: i32) -> (i32, i32) {
    %c0_i32 = arith.constant 0 : i32
    %c0_i32_0 = arith.constant 0 : i32
    return %c0_i32, %arg0 : i32, i32
  }
  func.func @transform_1(%arg0: i32) -> (i32, i32) {
    %c0_i32 = arith.constant 0 : i32
    %c0_i32_0 = arith.constant 0 : i32
    %c0_i32_1 = arith.constant 0 : i32
    return %c0_i32, %c0_i32_0 : i32, i32
  }
  func.func @transform_2(%arg0: i32) -> (i32, i32) {
    %c0_i32 = arith.constant 0 : i32
    %c0_i32_0 = arith.constant 0 : i32
    %c0_i32_1 = arith.constant 0 : i32
    return %c0_i32, %c0_i32_0 : i32, i32
  }
  func.func @transform_3(%arg0: i32) -> (i32, i32) {
    %c0_i32 = arith.constant 0 : i32
    %c0_i32_0 = arith.constant 0 : i32
    %c0_i32_1 = arith.constant 0 : i32
    return %c0_i32, %c0_i32_0 : i32, i32
  }
  func.func @transform_4(%arg0: i32) -> (i32, i32) {
    %c0_i32 = arith.constant 0 : i32
    %c0_i32_0 = arith.constant 0 : i32
    return %c0_i32, %arg0 : i32, i32
  }
}

</mosaic_0001>

<bundles_post_ra>
// kernel: tpu_custom_call.1
= control target key start
LH: loop header
LB: loop body
LE: loop exit
PB: predicated region body
PF: predicated region fallthrough
CT: control target
= control target key end

     0   :  { %s1293_s0 = inlined_call_operand.vmem [shape: f32[8,1024], index: 0, kind: input, shape index: {}]   ;;  %s1294_s1 = inlined_call_operand.vmem [shape: f32[32,8], index: 1, kind: input, shape index: {}]   ;;  %s1295_s2 = inlined_call_operand.vmem [shape: f32[32,1], index: 2, kind: input, shape index: {}]   ;;  %s1296_s3 = inlined_call_operand.<no memory space> [shape: f32[1,1], index: 3, kind: input, shape index: {}]   ;;  %s1297_s4 = inlined_call_operand.hbm [shape: f32[8,128], index: 4, kind: output, shape index: {}]  }
   0x1   :  { %v9_v0 = vstv %s1296_s3 }
   0x2   :  { %10 = vst [vmem:[#allocation2] sm:$0x1] %v9_v0 }
   0x3   :  { %v1062_v1 = vld [vmem:[%s1295_s2 + $0x10] sm:$0xff]  ;;  %v1067_v2 = vld [vmem:[%s1295_s2] sm:$0xff]  ;;  %vm36_vm0 = vcmask 1043456   ;;  %v1029_v4 = vmov 0   ;;  %v142_v6 = vld [vmem:[%s1293_s0 + $0x8] sm:$0xff]  ;;  %vm29_vm1 = vcmask 64512  }
   0x4   :  { %v27_v3 = vld [vmem:[%s1293_s0] sm:$0xff]  ;;  %1004 = vset.pattern.permute.xlu1 %v1029_v4  ;;  %1003 = vset.pattern.permute.xlu0 %v1029_v4  ;;  %v1078_v7 = vld [vmem:[%s1295_s2 + $0x18] sm:$0xff]  ;;  %v1083_v8 = vld [vmem:[%s1295_s2 + $0x8] sm:$0xff]  ;;  %v143_v9 = vpack.c.bf16 %v142_v6, %v142_v6 }
   0x5   :  { %v28_v5 = vpack.c.bf16 %v27_v3, %v27_v3  ;;  %109 = vperm.xlu1 %1004, %v1062_v1   ;;  %99 = vperm.xlu0 %1003, %v1067_v2   ;;  %v21_v10 = vld [vmem:[%s1294_s1] sm:$0xff]  ;;  %v22_v11 = vld [vmem:[%s1294_s1 + $0x8] sm:$0xff]  ;;  %v23_v12 = vld [vmem:[%s1294_s1 + $0x10] sm:$0xff] }
   0x6   :  { %v1098_v14 = vpack.c.bf16 %v22_v11, %v21_v10  ;;  %v24_v15 = vld [vmem:[%s1294_s1 + $0x18] sm:$0xff]  ;;  %v249_v16 = vld [vmem:[%s1293_s0 + $0x10] sm:$0xff]  ;;  %994 = vmatprep.subr.msk.bf16.mxu1 %vm36_vm0, %v143_v9  ;;  %v145_v18 = vsel %vm36_vm0, %v143_v9, 0  ;;  %v463_v22 = vld [vmem:[%s1293_s0 + $0x20] sm:$0xff] }
   0x7   :  { %993 = vmatprep.subr.msk.bf16.mxu0 %vm36_vm0, %v28_v5  ;;  %v38_v13 = vsel %vm36_vm0, %v28_v5, 0  ;;  %v356_v17 = vld [vmem:[%s1293_s0 + $0x18] sm:$0xff]  ;;  %v1111_v19 = vpack.c.bf16 %v24_v15, %v23_v12  ;;  %v250_v20 = vpack.c.bf16 %v249_v16, %v249_v16  ;;  %952 = vmatpush3.bf16.msra.mxu1 %v145_v18  ;;  %v570_v24 = vld [vmem:[%s1293_s0 + $0x28] sm:$0xff]  ;;  %v464_v27 = vpack.c.bf16 %v463_v22, %v463_v22 }
   0x8   :  { %946 = vmatpush3.bf16.msra.mxu0 %v38_v13  ;;  %v357_v21 = vpack.c.bf16 %v356_v17, %v356_v17  ;;  %947 = vmatprep.mubr.msk.bf16.mxu0 %vm29_vm1, %v1098_v14  ;;  %v571_v28 = vpack.c.bf16 %v570_v24, %v570_v24 }
   0x9   :  { %114 = vperm.xlu1 %1004, %v1078_v7   ;;  %104 = vperm.xlu0 %1003, %v1083_v8   ;;  %v252_v23 = vsel %vm36_vm0, %v250_v20, 0  ;;  %v130_v26 = vld [vmem:[#allocation2] sm:$0x1] }
   0xa   :  { %953 = vmatprep.mubr.msk.bf16.mxu1 %vm29_vm1, %v1098_v14  ;;  %v359_v25 = vsel %vm36_vm0, %v357_v21, 0  ;;  %995 = vmatprep.subr.msk.bf16.mxu0 %vm36_vm0, %v250_v20 }
   0xb   :  { %948 = vmatmul.mubr.msk.bf16.vlgmr.msra.gmra.mrb[0].mxu0 %vm29_vm1, %v1111_v19  ;;  %954 = vmatmul.mubr.msk.bf16.vlgmr.msra.gmra.mrb[0].mxu1 %vm29_vm1, %v1111_v19 }
   0xc   :  { %996 = vmatprep.subr.msk.bf16.mxu1 %vm36_vm0, %v357_v21  ;;  %958 = vmatpush3.bf16.msra.mxu0 %v252_v23 }
   0xd   :  { %11 = vsyncpa [#allocation4], 0  ;;  %964 = vmatpush3.bf16.msra.mxu1 %v359_v25  ;;  %206 = vperm.xlu1 %1004, %v1067_v2   ;;  %v677_v29 = vld [vmem:[%s1293_s0 + $0x30] sm:$0xff]  ;;  %v466_v30 = vsel %vm36_vm0, %v464_v27, 0  ;;  %v784_v31 = vld [vmem:[%s1293_s0 + $0x38] sm:$0xff]  ;;  %v573_v32 = vsel %vm36_vm0, %v571_v28, 0  ;;  %v136_v21 = vlaneseq }
   0xe   :  { %133 = vperm.xlu0 %1003, %v130_v26   ;;  %959 = vmatprep.mubr.msk.bf16.mxu0 %vm29_vm1, %v1098_v14  ;;  %v237_v33 = vld [vmem:[#allocation2] sm:$0x1]  ;;  %v678_v34 = vpack.c.bf16 %v677_v29, %v677_v29  ;;  %v785_v35 = vpack.c.bf16 %v784_v31, %v784_v31  ;;  %s1030_s0 = smov [#allocation3]  }
   0xf   :  { %965 = vmatprep.mubr.msk.bf16.mxu1 %vm29_vm1, %v1098_v14  ;;  %997 = vmatprep.subr.msk.bf16.mxu0 %vm36_vm0, %v464_v27  ;;  %v344_v38 = vld [vmem:[#allocation2] sm:$0x1]  ;;  %s897_s20 = sshll.u32 %s1030_s0, 4  ;;  %s898_s20 = int_to_ptr.vmem [resolvable:$true] %s897_s20 }
  0x10   :  { %998 = vmatprep.subr.msk.bf16.mxu1 %vm36_vm0, %v571_v28  ;;  %v680_v36 = vsel %vm36_vm0, %v678_v34, 0  ;;  %v787_v37 = vsel %vm36_vm0, %v785_v35, 0  ;;  %v451_v39 = vld [vmem:[#allocation2] sm:$0x1]  ;;  %s1005_s21 = scalar_lea.vmem %s898_s20, 128  ;;  %p1010_p1 = scmp.lt.s32.totalorder %s898_s20, %s898_s20 }
  0x11   :  { %216 = vperm.xlu1 %1004, %v1062_v1   ;;  %v665_v40 = vld [vmem:[#allocation2] sm:$0x1]  ;;  %p1006_p0 = scmp.ne.s32.totalorder %s898_s20, %s1005_s21  ;;  %p1011_p2 = scmp.lt.s32.totalorder %s1005_s21, %s1005_s21 }
  0x12   :  { %211 = vperm.xlu0 %1003, %v1083_v8   ;;  %v558_v41 = vld [vmem:[#allocation2] sm:$0x1] }
  0x13   :  { %960 = vmatmul.mubr.msk.bf16.vlgmr.msra.gmra.mrb[4].mxu0 %vm29_vm1, %v1111_v19  ;;  %966 = vmatmul.mubr.msk.bf16.vlgmr.msra.gmra.mrb[4].mxu1 %vm29_vm1, %v1111_v19  ;;  %v879_v42 = vld [vmem:[#allocation2] sm:$0x1]  ;;  %p1012_p3 = por %p1011_p2, %p1010_p1 }
  0x14   :  { %970 = vmatpush3.bf16.msra.mxu0 %v466_v30  ;;  %976 = vmatpush3.bf16.msra.mxu1 %v573_v32  ;;  %v772_v43 = vld [vmem:[#allocation2] sm:$0x1] }
  0x15   :  { %971 = vmatprep.mubr.msk.bf16.mxu0 %vm29_vm1, %v1098_v14  ;;  %240 = vperm.xlu1 %1004, %v237_v33   ;;  %p1013_p4 = pnand %p1012_p3, %p1006_p0 }
  0x16   :  { %977 = vmatprep.mubr.msk.bf16.mxu1 %vm29_vm1, %v1098_v14  ;;  %221 = vperm.xlu0 %1003, %v1078_v7  }
  0x17   :  { %999 = vmatprep.subr.msk.bf16.mxu0 %vm36_vm0, %v678_v34  ;;  %1000 = vmatprep.subr.msk.bf16.mxu1 %vm36_vm0, %v785_v35  ;;  %v137_v35 = vshrl.u32 %v136_v21, 7 }
  0x19   :  { %318 = vperm.xlu1 %1004, %v1083_v8  }
  0x1a   :  { %313 = vperm.xlu0 %1003, %v1067_v2  }
  0x1b   :  { %972 = vmatmul.mubr.msk.bf16.vlgmr.msra.gmra.mrb[8].mxu0 %vm29_vm1, %v1111_v19  ;;  %978 = vmatmul.mubr.msk.bf16.vlgmr.msra.gmra.mrb[8].mxu1 %vm29_vm1, %v1111_v19 }
  0x1c   :  { %982 = vmatpush3.bf16.msra.mxu0 %v680_v36  ;;  %988 = vmatpush3.bf16.msra.mxu1 %v787_v37 }
  0x1d   :  { %983 = vmatprep.mubr.msk.bf16.mxu0 %vm29_vm1, %v1098_v14  ;;  %328 = vperm.xlu1 %1004, %v1078_v7  }
  0x1e   :  { %989 = vmatprep.mubr.msk.bf16.mxu1 %vm29_vm1, %v1098_v14  ;;  %323 = vperm.xlu0 %1003, %v1062_v1  }
  0x21   :  { %420 = vperm.xlu1 %1004, %v1067_v2  }
  0x22   :  { %347 = vperm.xlu0 %1003, %v344_v38  }
  0x23   :  { %984 = vmatmul.mubr.msk.bf16.vlgmr.msra.gmra.mrb[12].mxu0 %vm29_vm1, %v1111_v19  ;;  %990 = vmatmul.mubr.msk.bf16.vlgmr.msra.gmra.mrb[12].mxu1 %vm29_vm1, %v1111_v19 }
  0x25   :  { %430 = vperm.xlu1 %1004, %v1062_v1  }
  0x26   :  { %425 = vperm.xlu0 %1003, %v1083_v8  }
  0x29   :  { %532 = vperm.xlu1 %1004, %v1083_v8  }
  0x2a   :  { %527 = vperm.xlu0 %1003, %v1067_v2  }
  0x2d   :  { %639 = vperm.xlu1 %1004, %v1083_v8  }
  0x2e   :  { %634 = vperm.xlu0 %1003, %v1067_v2  }
  0x31   :  { %746 = vperm.xlu1 %1004, %v1083_v8  }
  0x32   :  { %741 = vperm.xlu0 %1003, %v1067_v2  }
  0x35   :  { %853 = vperm.xlu1 %1004, %v1083_v8  }
  0x36   :  { %848 = vperm.xlu0 %1003, %v1067_v2  }
  0x39   :  { %644 = vperm.xlu1 %1004, %v1062_v1  }
  0x3a   :  { %537 = vperm.xlu0 %1003, %v1062_v1  }
  0x3d   :  { %858 = vperm.xlu1 %1004, %v1062_v1  }
  0x3e   :  { %751 = vperm.xlu0 %1003, %v1062_v1  }
  0x41   :  { %542 = vperm.xlu1 %1004, %v1078_v7  }
  0x42   :  { %435 = vperm.xlu0 %1003, %v1078_v7  }
  0x45   :  { %756 = vperm.xlu1 %1004, %v1078_v7  }
  0x46   :  { %649 = vperm.xlu0 %1003, %v1078_v7  }
  0x49   :  { %454 = vperm.xlu1 %1004, %v451_v39  }
  0x4a   :  { %863 = vperm.xlu0 %1003, %v1078_v7  }
  0x4d   :  { %668 = vperm.xlu1 %1004, %v665_v40  }
  0x4e   :  { %561 = vperm.xlu0 %1003, %v558_v41  }
  0x51   :  { %882 = vperm.xlu1 %1004, %v879_v42  }
  0x52   :  { %775 = vperm.xlu0 %1003, %v772_v43  }
  0x84   :  { %v110_v44 = vpop.permute.xlu1 %109  ;;  %v100_v45 = vpop.permute.xlu0 %99 }
  0x88   :  { %v115_v46 = vpop.permute.xlu1 %114  ;;  %v105_v47 = vpop.permute.xlu0 %104 }
  0x8c   :  { %v207_v48 = vpop.permute.xlu1 %206 }
  0x8d   :  { %v1199_v49 = vpop.permute.xlu0 %133 }
  0x90   :  { %v217_v50 = vpop.permute.xlu1 %216 }
  0x91   :  { %v212_v51 = vpop.permute.xlu0 %211 }
  0x94   :  { %v1201_v52 = vpop.permute.xlu1 %240 }
  0x95   :  { %v222_v53 = vpop.permute.xlu0 %221 }
  0x98   :  { %v1203_v54 = vpop.permute.xlu1 %318 }
  0x99   :  { %v1205_v55 = vpop.permute.xlu0 %313 }
  0x9c   :  { %v1207_v56 = vpop.permute.xlu1 %328 }
  0x9d   :  { %v1209_v57 = vpop.permute.xlu0 %323 }
  0xa0   :  { %v1211_v58 = vpop.permute.xlu1 %420 }
  0xa1   :  { %v1213_v59 = vpop.permute.xlu0 %347 }
  0xa4   :  { %v1215_v60 = vpop.permute.xlu1 %430 }
  0xa5   :  { %v1217_v61 = vpop.permute.xlu0 %425 }
  0xa8   :  { %v1219_v62 = vpop.permute.xlu1 %532 }
  0xa9   :  { %v1221_v63 = vpop.permute.xlu0 %527 }
  0xac   :  { %v1223_v0 = vpop.permute.xlu1 %639 }
  0xad   :  { %v1225_v1 = vpop.permute.xlu0 %634 }
  0xb0   :  { %v1227_v2 = vpop.permute.xlu1 %746 }
  0xb1   :  { %v1229_v3 = vpop.permute.xlu0 %741 }
  0xb4   :  { %v1231_v4 = vpop.permute.xlu1 %853 }
  0xb5   :  { %v1233_v5 = vpop.permute.xlu0 %848 }
  0xb8   :  { %v1235_v6 = vpop.permute.xlu1 %644 }
  0xb9   :  { %v1237_v7 = vpop.permute.xlu0 %537 }
  0xbc   :  { %v1239_v8 = vpop.permute.xlu1 %858 }
  0xbd   :  { %v1241_v27 = vpop.permute.xlu0 %751 }
  0xc0   :  { %v1243_v31 = vpop.permute.xlu1 %542 }
  0xc4   :  { %v1249_v21 = vpop.permute.xlu1 %756 }
  0xde   :  { %v949_v9 = vpop.f32.mrb[0].mxu0  ;;  %v955_v10 = vpop.f32.mrb[0].mxu1 }
  0xdf   :  { %v74_v11 = vpop.f32.mrb[1].mxu0  ;;  %v181_v13 = vpop.f32.mrb[1].mxu1  ;;  %v91_v18 = vmax.f32 %v949_v9, 0.0  ;;  %v198_v22 = vmax.f32 %v955_v10, 0.0 }
  0xe0   :  { %v89_v12 = vmax.f32 %v74_v11, 0.0  ;;  %v950_v14 = vpop.f32.mrb[2].mxu0  ;;  %v196_v15 = vmax.f32 %v181_v13, 0.0  ;;  %v956_v16 = vpop.f32.mrb[2].mxu1 }
  0xe1   :  { %v77_v17 = vpop.f32.mrb[3].mxu0  ;;  %v184_v20 = vpop.f32.mrb[3].mxu1  ;;  %v92_v25 = vmax.f32 %v950_v14, 0.0  ;;  %v199_v29 = vmax.f32 %v956_v16, 0.0  ;;  %v119_v32 = vmul.f32 %v110_v44, %v91_v18  ;;  %v226_v36 = vmul.f32 %v217_v50, %v198_v22 }
  0xe2   :  { %v90_v19 = vmax.f32 %v77_v17, 0.0  ;;  %v197_v23 = vmax.f32 %v184_v20, 0.0  ;;  %v117_v24 = vmul.f32 %v100_v45, %v89_v12  ;;  %v224_v28 = vmul.f32 %v207_v48, %v196_v15 }
  0xe3   :  { %v120_v40 = vmul.f32 %v115_v46, %v92_v25  ;;  %v227_v45 = vmul.f32 %v222_v53, %v199_v29  ;;  %v1245_v44 = vsub.s32 0, %v137_v35  ;;  %v436_v46 = vpop.permute.xlu0 %435 }
  0xe4   :  { %v118_v26 = vmul.f32 %v105_v47, %v90_v19  ;;  %v225_v30 = vmul.f32 %v212_v51, %v197_v23 }
  0xe6   :  { %v121_v33 = vadd.f32 %v118_v26, %v117_v24  ;;  %v961_v34 = vpop.f32.mrb[4].mxu0  ;;  %v228_v37 = vadd.f32 %v225_v30, %v224_v28  ;;  %v967_v38 = vpop.f32.mrb[4].mxu1  ;;  %v139_v28 = vrot.slane %v1199_v49, %v1245_v44 }
  0xe7   :  { %v288_v39 = vpop.f32.mrb[5].mxu0  ;;  %v395_v42 = vpop.f32.mrb[5].mxu1  ;;  %v305_v14 = vmax.f32 %v961_v34, 0.0  ;;  %v412_v16 = vmax.f32 %v967_v38, 0.0 }
  0xe8   :  { %v122_v41 = vadd.f32 %v121_v33, %v119_v32  ;;  %v962_v43 = vpop.f32.mrb[6].mxu0  ;;  %v229_v47 = vadd.f32 %v228_v37, %v226_v36  ;;  %v303_v9 = vmax.f32 %v288_v39, 0.0  ;;  %v968_v48 = vpop.f32.mrb[6].mxu1  ;;  %v410_v11 = vmax.f32 %v395_v42, 0.0 }
  0xe9   :  { %v291_v10 = vpop.f32.mrb[7].mxu0  ;;  %v398_v12 = vpop.f32.mrb[7].mxu1  ;;  %v306_v53 = vmax.f32 %v962_v43, 0.0  ;;  %v413_v24 = vmax.f32 %v968_v48, 0.0  ;;  %v333_v30 = vmul.f32 %v1209_v57, %v305_v14  ;;  %v246_v57 = vrot.slane %v1201_v52, %v1245_v44 }
  0xea   :  { %v123_v51 = vadd.f32 %v122_v41, %v120_v40  ;;  %v230_v13 = vadd.f32 %v229_v47, %v227_v45  ;;  %v304_v50 = vmax.f32 %v291_v10, 0.0  ;;  %v411_v17 = vmax.f32 %v398_v12, 0.0  ;;  %v455_v52 = vpop.permute.xlu1 %454 }
  0xeb   :  { %v331_v19 = vmul.f32 %v1205_v55, %v303_v9  ;;  %v438_v23 = vmul.f32 %v1211_v58, %v410_v11  ;;  %v441_v43 = vmul.f32 %v436_v46, %v413_v24 }
  0xec   :  { %v124_v15 = vrot.slane %v123_v51, 4  ;;  %v231_v18 = vrot.slane %v230_v13, 4  ;;  %v332_v20 = vmul.f32 %v1203_v54, %v304_v50  ;;  %v439_v25 = vmul.f32 %v1217_v61, %v411_v17 }
  0xed   :  { %v440_v54 = vmul.f32 %v1215_v60, %v412_v16  ;;  %v334_v61 = vmul.f32 %v1207_v56, %v306_v53 }
  0xee   :  { %v125_v22 = vadd.f32 %v124_v15, %v123_v51  ;;  %v973_v26 = vpop.f32.mrb[8].mxu0  ;;  %v232_v29 = vadd.f32 %v231_v18, %v230_v13  ;;  %v335_v32 = vadd.f32 %v332_v20, %v331_v19  ;;  %v979_v55 = vpop.f32.mrb[8].mxu1  ;;  %v442_v35 = vadd.f32 %v439_v25, %v438_v23 }
  0xef   :  { %v502_v33 = vpop.f32.mrb[9].mxu0  ;;  %v609_v37 = vpop.f32.mrb[9].mxu1  ;;  %v519_v48 = vmax.f32 %v973_v26, 0.0  ;;  %v626_v10 = vmax.f32 %v979_v55, 0.0 }
  0xf0   :  { %v126_v34 = vrot.slane %v125_v22, 2  ;;  %v517_v36 = vmax.f32 %v502_v33, 0.0  ;;  %v974_v58 = vpop.f32.mrb[10].mxu0  ;;  %v233_v38 = vrot.slane %v232_v29, 2  ;;  %v336_v39 = vadd.f32 %v335_v32, %v333_v30  ;;  %v980_v41 = vpop.f32.mrb[10].mxu1 }
  0xf1   :  { %v624_v40 = vmax.f32 %v609_v37, 0.0  ;;  %v505_v49 = vpop.f32.mrb[11].mxu0  ;;  %v443_v45 = vadd.f32 %v442_v35, %v440_v54  ;;  %v612_v47 = vpop.f32.mrb[11].mxu1  ;;  %v520_v18 = vmax.f32 %v974_v58, 0.0  ;;  %v627_v23 = vmax.f32 %v980_v41, 0.0 }
  0xf2   :  { %v127_v42 = vadd.f32 %v126_v34, %v125_v22  ;;  %v234_v9 = vadd.f32 %v233_v38, %v232_v29  ;;  %v337_v60 = vadd.f32 %v336_v39, %v334_v61  ;;  %v545_v12 = vmul.f32 %v1221_v63, %v517_v36  ;;  %v650_v13 = vpop.permute.xlu0 %649 }
  0xf3   :  { %v444_v11 = vadd.f32 %v443_v45, %v441_v43  ;;  %v518_v56 = vmax.f32 %v505_v49, 0.0  ;;  %v652_v15 = vmul.f32 %v1225_v1, %v624_v40  ;;  %v625_v16 = vmax.f32 %v612_v47, 0.0 }
  0xf4   :  { %v128_v51 = vrot.slane %v127_v42, 1  ;;  %v235_v14 = vrot.slane %v234_v9, 1  ;;  %v338_v50 = vrot.slane %v337_v60, 4  ;;  %v547_v30 = vmul.f32 %v1237_v7, %v519_v48 }
  0xf5   :  { %v445_v46 = vrot.slane %v444_v11, 4  ;;  %v546_v19 = vmul.f32 %v1219_v62, %v518_v56  ;;  %v653_v24 = vmul.f32 %v1223_v0, %v625_v16  ;;  %v654_v54 = vmul.f32 %v1235_v6, %v626_v10 }
  0xf6   :  { %v129_v17 = vadd.f32 %v128_v51, %v127_v42  ;;  %v985_v53 = vpop.f32.mrb[12].mxu0  ;;  %v236_v20 = vadd.f32 %v235_v14, %v234_v9  ;;  %v339_v22 = vadd.f32 %v338_v50, %v337_v60  ;;  %v991_v63 = vpop.f32.mrb[12].mxu1  ;;  %v353_v37 = vrot.slane %v1213_v59, %v1245_v44 }
  0xf7   :  { %v716_v25 = vpop.f32.mrb[13].mxu0  ;;  %v446_v29 = vadd.f32 %v445_v46, %v444_v11  ;;  %v549_v1 = vadd.f32 %v546_v19, %v545_v12  ;;  %v823_v32 = vpop.f32.mrb[13].mxu1  ;;  %v656_v62 = vadd.f32 %v653_v24, %v652_v15  ;;  %v655_v61 = vmul.f32 %v650_v13, %v627_v23 }
  0xf8   :  { %v140_v26 = vadd.f32 %v139_v28, %v129_v17  ;;  %v986_v55 = vpop.f32.mrb[14].mxu0  ;;  %v247_v33 = vadd.f32 %v246_v57, %v236_v20  ;;  %v340_v34 = vrot.slane %v339_v22, 2  ;;  %v992_v35 = vpop.f32.mrb[14].mxu1  ;;  %v548_v28 = vmul.f32 %v1243_v31, %v520_v18 }
  0xf9   :  { %v719_v36 = vpop.f32.mrb[15].mxu0  ;;  %v447_v0 = vrot.slane %v446_v29, 2  ;;  %v550_v58 = vadd.f32 %v549_v1, %v547_v30  ;;  %v826_v38 = vpop.f32.mrb[15].mxu1  ;;  %v657_v39 = vadd.f32 %v656_v62, %v654_v54  ;;  %v731_v40 = vmax.f32 %v716_v25, 0.0 }
  0xfa   :  { %141 = vst [vmem:[#allocation3] sm:$0x1] %v140_v26  ;;  %248 = vst [vmem:[#allocation3 + $0x1] sm:$0x1] %v247_v33  ;;  %v341_v7 = vadd.f32 %v340_v34, %v339_v22  ;;  %v460_v41 = vrot.slane %v455_v52, %v1245_v44  ;;  %v733_v57 = vmax.f32 %v985_v53, 0.0  ;;  %v840_v45 = vmax.f32 %v991_v63, 0.0  ;;  %v864_v48 = vpop.permute.xlu0 %863 }
  0xfb   :  { %v448_v6 = vadd.f32 %v447_v0, %v446_v29  ;;  %v551_v49 = vadd.f32 %v550_v58, %v548_v28  ;;  %v658_v43 = vadd.f32 %v657_v39, %v655_v61  ;;  %v838_v59 = vmax.f32 %v823_v32, 0.0 }
  0xfc   :  { %v342_v42 = vrot.slane %v341_v7, 1  ;;  %v734_v60 = vmax.f32 %v986_v55, 0.0  ;;  %v732_v31 = vmax.f32 %v719_v36, 0.0  ;;  %v759_v11 = vmul.f32 %v1229_v3, %v731_v40 }
  0xfd   :  { %v449_v47 = vrot.slane %v448_v6, 1  ;;  %v552_v9 = vrot.slane %v551_v49, 4  ;;  %v659_v51 = vrot.slane %v658_v43, 4  ;;  %v839_v12 = vmax.f32 %v826_v38, 0.0 }
  0xfe   :  { %v343_v10 = vadd.f32 %v342_v42, %v341_v7  ;;  %v841_v14 = vmax.f32 %v992_v35, 0.0  ;;  %v760_v50 = vmul.f32 %v1227_v2, %v732_v31  ;;  %v866_v52 = vmul.f32 %v1233_v5, %v838_v59  ;;  %v562_v63 = vpop.permute.xlu0 %561 }
  0xff   :  { %v450_v56 = vadd.f32 %v449_v47, %v448_v6  ;;  %v553_v13 = vadd.f32 %v552_v9, %v551_v49  ;;  %v660_v16 = vadd.f32 %v659_v51, %v658_v43  ;;  %v867_v17 = vmul.f32 %v1231_v4, %v839_v12  ;;  %v669_v4 = vpop.permute.xlu1 %668 }
 0x100   :  { %v354_v15 = vadd.f32 %v353_v37, %v343_v10  ;;  %v761_v19 = vmul.f32 %v1241_v27, %v733_v57  ;;  %v763_v53 = vadd.f32 %v760_v50, %v759_v11  ;;  %v868_v3 = vmul.f32 %v1239_v8, %v840_v45 }
 0x101   :  { %v461_v46 = vadd.f32 %v460_v41, %v450_v56  ;;  %v554_v18 = vrot.slane %v553_v13, 2  ;;  %v661_v20 = vrot.slane %v660_v16, 2  ;;  %v870_v22 = vadd.f32 %v867_v17, %v866_v52 }
 0x102   :  { %355 = vst [vmem:[#allocation3 + $0x2] sm:$0x1] %v354_v15  ;;  %v762_v2 = vmul.f32 %v1249_v21, %v734_v60  ;;  %v764_v24 = vadd.f32 %v763_v53, %v761_v19  ;;  %v869_v5 = vmul.f32 %v864_v48, %v841_v14  ;;  %v567_v32 = vrot.slane %v562_v63, %v1245_v44  ;;  %v776_v58 = vpop.permute.xlu0 %775 }
 0x103   :  { %462 = vst [vmem:[#allocation3 + $0x3] sm:$0x1] %v461_v46  ;;  %v555_v23 = vadd.f32 %v554_v18, %v553_v13  ;;  %v662_v25 = vadd.f32 %v661_v20, %v660_v16  ;;  %v871_v26 = vadd.f32 %v870_v22, %v868_v3  ;;  %v674_v8 = vrot.slane %v669_v4, %v1245_v44  ;;  %v883_v7 = vpop.permute.xlu1 %882 }
 0x104   :  { %v765_v30 = vadd.f32 %v764_v24, %v762_v2  ;;  %v781_v40 = vrot.slane %v776_v58, %v1245_v44  ;;  %v888_v6 = vrot.slane %v883_v7, %v1245_v44 }
 0x105   :  { %v556_v29 = vrot.slane %v555_v23, 1  ;;  %v663_v1 = vrot.slane %v662_v25, 1  ;;  %v872_v27 = vadd.f32 %v871_v26, %v869_v5 }
 0x106   :  { %v766_v33 = vrot.slane %v765_v30, 4 }
 0x107   :  { %v557_v55 = vadd.f32 %v556_v29, %v555_v23  ;;  %v664_v34 = vadd.f32 %v663_v1, %v662_v25  ;;  %v873_v54 = vrot.slane %v872_v27, 4 }
 0x108   :  { %v767_v21 = vadd.f32 %v766_v33, %v765_v30 }
 0x109   :  { %v568_v62 = vadd.f32 %v567_v32, %v557_v55  ;;  %v675_v35 = vadd.f32 %v674_v8, %v664_v34  ;;  %v874_v36 = vadd.f32 %v873_v54, %v872_v27 }
 0x10a   :  { %v768_v37 = vrot.slane %v767_v21, 2 }
 0x10b   :  { %569 = vst [vmem:[#allocation3 + $0x4] sm:$0x1] %v568_v62  ;;  %676 = vst [vmem:[#allocation3 + $0x5] sm:$0x1] %v675_v35  ;;  %v875_v0 = vrot.slane %v874_v36, 2 }
 0x10c   :  { %v769_v28 = vadd.f32 %v768_v37, %v767_v21 }
 0x10d   :  { %v876_v38 = vadd.f32 %v875_v0, %v874_v36 }
 0x10e   :  { %v770_v61 = vrot.slane %v769_v28, 1 }
 0x10f   :  { %v877_v39 = vrot.slane %v876_v38, 1 }
 0x110   :  { %v771_v41 = vadd.f32 %v770_v61, %v769_v28 }
 0x111   :  { %v878_v49 = vadd.f32 %v877_v39, %v876_v38 }
 0x112   :  { %v782_v57 = vadd.f32 %v781_v40, %v771_v41 }
 0x113   :  { %v889_v42 = vadd.f32 %v888_v6, %v878_v49 }
 0x114   :  { %783 = vst [vmem:[#allocation3 + $0x6] sm:$0x1] %v782_v57 }
 0x115   :  { %890 = vst [vmem:[#allocation3 + $0x7] sm:$0x1] %v889_v42 }
 0x116   :  { %1016 = shalt.err (!%p1013_p4)
}
 0x117   :  { %s1017_s23 = scalar_lea.hbm %s1297_s4, 128 }
 0x118   :  { %p1018_p5 = scmp.ne.s32.totalorder %s1297_s4, %s1017_s23  ;;  %p1021_p6 = scmp.lt.u32.totalorder %s1017_s23, %s1297_s4 }
 0x11a   :  { %p1023_p7 = pnand %p1021_p6, %p1018_p5 }
 0x11c   :  { %1026 = shalt.err (!%p1023_p7)
}
 0x11d   :  { %900 = dma.vmem_to_hbm [thread:$0]  %s898_s20, 128, %s1297_s4, [#allocation4]  }
 0x11e   :  { %1027 = dma.done.wait [#allocation4], 128  }
 0x11f   :  { %1028 = vsyncadd [#allocation4], 4294967168 }
 0x120   :  { %904 = vsyncpa [#allocation4], 1 }

</bundles_post_ra>
